<compile_context>
chip_gen: v7x
topology: tpu7x:2x2x1
jax: 0.10.0
libtpu: 0.0.40
codegen_flags: <defaults>
</compile_context>

<pallas_src>
import functools

import jax
import jax.numpy as jnp
from jax.experimental import pallas as pl
from jax.experimental.pallas import tpu as pltpu


def _fgeb_kernel(x_ref, y_ref, z_ref, w1_ref, b1_ref, w2_ref, b2_ref, out_ref,
                 *, hw_true: int):
    """Per-batch tile.

    x_ref, y_ref, z_ref, out_ref : (1, C, HWp)
    w1_ref : (Hid, 3C)   b1_ref : (Hid, 1)
    w2_ref : (C, Hid)    b2_ref : (C, 1)
    """
    C = out_ref.shape[1]
    HWp = out_ref.shape[2]

    x_t = x_ref[0].astype(jnp.float32)     # (C, HWp)
    y_t = y_ref[0].astype(jnp.float32)
    z_t = z_ref[0].astype(jnp.float32)

    # AdaptiveAvgPool2d(1) == mean over the (zero-padded) spatial axis.
    # Done as a ones-vector matmul so the reduction runs on the (idle) MXU.
    ones_col = jnp.ones((HWp, 1), jnp.float32)
    inv_hw = jnp.float32(1.0 / hw_true)
    x_avg = jnp.dot(x_t, ones_col, preferred_element_type=jnp.float32) * inv_hw  # (C, 1)
    y_avg = jnp.dot(y_t, ones_col, preferred_element_type=jnp.float32) * inv_hw  # (C, 1)
    z_avg = jnp.dot(z_t, ones_col, preferred_element_type=jnp.float32) * inv_hw  # (C, 1)

    # fc1(concat([x_avg, y_avg, z_avg])) as three partial matmuls with static
    # column slices of W1 (avoids materializing the concatenated vector).
    w1 = w1_ref[...]                       # (Hid, 3C)
    h = (jnp.dot(w1[:, 0:C], x_avg, preferred_element_type=jnp.float32)
         + jnp.dot(w1[:, C:2 * C], y_avg, preferred_element_type=jnp.float32)
         + jnp.dot(w1[:, 2 * C:3 * C], z_avg, preferred_element_type=jnp.float32)
         + b1_ref[...])                    # (Hid, 1)

    # LeakyReLU(negative_slope=0.01)
    h = jnp.where(h > 0, h, jnp.float32(0.01) * h)

    # fc2 + sigmoid -> gate f: a (C, 1) column broadcast over the lane axis.
    f = jnp.dot(w2_ref[...], h, preferred_element_type=jnp.float32) + b2_ref[...]
    f = jax.nn.sigmoid(f)                  # (C, 1)

    out_ref[0] = (z_t * f).astype(out_ref.dtype)


def fgeb_forward(x, y, z, w1, b1, w2, b2):
    """x, y, z: (B, C, H, W) (NCHW, like PyTorch). Returns (B, C, H, W).

    Weights in PyTorch nn.Linear layout:
      w1: (Hid, 3C), b1: (Hid,), w2: (C, Hid), b2: (C,)
    """
    B, C, H, W = x.shape
    HW = H * W
    HWp = ((HW + 127) // 128) * 128        # lane-dense blocks (multiple of 128)
    hid = w1.shape[0]
    assert w1.shape == (hid, 3 * C) and w2.shape == (C, hid)

    def prep(a):
        a3 = a.reshape(B, C, HW).astype(jnp.float32)
        if HWp != HW:
            a3 = jnp.pad(a3, ((0, 0), (0, 0), (0, HWp - HW)))
        return a3

    x3, y3, z3 = prep(x), prep(y), prep(z)
    w1f = w1.astype(jnp.float32)
    w2f = w2.astype(jnp.float32)
    b1c = b1.reshape(hid, 1).astype(jnp.float32)
    b2c = b2.reshape(C, 1).astype(jnp.float32)

    itemsize = 4  # f32 streaming
    tile_bytes = C * HWp * itemsize
    weight_bytes = (w1f.size + b1c.size + w2f.size + b2c.size) * itemsize
    # 4 streamed tensors (x, y, z, out), double-buffered, + resident weights + slack.
    vmem_bytes = int(min(max(2 * 4 * tile_bytes + 2 * weight_bytes + (2 << 20),
                             8 << 20), 64 << 20))
    # TODO(synk): for very large C*H*W where a (C, HW) tile no longer fits VMEM
    # (notably v7x's 64 MiB), switch to a two-stage reduce-then-apply kernel.

    cost = pl.CostEstimate(
        flops=int(B * (3 * 2 * C * HWp + 2 * 3 * C * hid + 2 * hid * C + C * HWp)),
        transcendentals=int(B * C),
        bytes_accessed=int(4 * B * C * HW * itemsize + weight_bytes),
    )

    def spatial_spec():
        return pl.BlockSpec((1, C, HWp), lambda b: (b, 0, 0))

    def const_spec(shape):
        return pl.BlockSpec(shape, lambda b: (0, 0))

    out = pl.pallas_call(
        functools.partial(_fgeb_kernel, hw_true=HW),
        out_shape=jax.ShapeDtypeStruct((B, C, HWp), jnp.float32),
        grid=(B,),
        in_specs=[
            spatial_spec(), spatial_spec(), spatial_spec(),
            const_spec((hid, 3 * C)), const_spec((hid, 1)),
            const_spec((C, hid)), const_spec((C, 1)),
        ],
        out_specs=spatial_spec(),
        compiler_params=pltpu.CompilerParams(
            dimension_semantics=("parallel",),
            vmem_limit_bytes=vmem_bytes,
        ),
        cost_estimate=cost,
    )(x3, y3, z3, w1f, b1c, w2f, b2c)

    if HWp != HW:
        out = out[:, :, :HW]
    return out.reshape(B, C, H, W)


def fgeb_reference(x, y, z, w1, b1, w2, b2):
    """Plain-JAX reference mirroring the PyTorch forward (PyTorch weight layout)."""
    xa = jnp.mean(x, axis=(2, 3))
    ya = jnp.mean(y, axis=(2, 3))
    za = jnp.mean(z, axis=(2, 3))
    feat = jnp.concatenate([xa, ya, za], axis=1)          # (B, 3C)
    h = feat @ w1.T + b1
    h = jnp.where(h > 0, h, 0.01 * h)
    f = jax.nn.sigmoid(h @ w2.T + b2)                     # (B, C)
    return z * f[:, :, None, None]


if __name__ == "__main__":
    # Small shapes consistent with the module: output_chl=C=64, reduction=8.
    B, C, H, W = 2, 64, 16, 16
    reduction = 8
    hidden = C // reduction

    key = jax.random.PRNGKey(0)
    kx, ky, kz, kw1, kb1, kw2, kb2 = jax.random.split(key, 7)

    x = jax.random.normal(kx, (B, C, H, W), dtype=jnp.float32)
    y = jax.random.normal(ky, (B, C, H, W), dtype=jnp.float32)
    z = jax.random.normal(kz, (B, C, H, W), dtype=jnp.float32)

    # PyTorch Linear layout (out_features, in_features); normal(0, 0.01) weights
    # as in _initialize_weights, small random biases for a non-trivial test.
    w1 = 0.01 * jax.random.normal(kw1, (hidden, 3 * C), dtype=jnp.float32)
    b1 = 0.01 * jax.random.normal(kb1, (hidden,), dtype=jnp.float32)
    w2 = 0.01 * jax.random.normal(kw2, (C, hidden), dtype=jnp.float32)
    b2 = 0.01 * jax.random.normal(kb2, (C,), dtype=jnp.float32)

    out = fgeb_forward(x, y, z, w1, b1, w2, b2)
    out = jax.block_until_ready(out)

    ref = fgeb_reference(x, y, z, w1, b1, w2, b2)
    assert out.shape == (B, C, H, W)
    assert jnp.allclose(out, ref, atol=1e-3, rtol=1e-3), "mismatch vs reference"

    print("KERNEL_OK")
</pallas_src>

<mosaic_0001>
module attributes {stable_mosaic.version = 11 : i64} {
  func.func @_fgeb_kernel(%arg0: i32, %arg1: memref<1x64x256xf32, #tpu.memory_space<vmem>>, %arg2: memref<1x64x256xf32, #tpu.memory_space<vmem>>, %arg3: memref<1x64x256xf32, #tpu.memory_space<vmem>>, %arg4: memref<8x192xf32, #tpu.memory_space<vmem>>, %arg5: memref<8x1xf32, #tpu.memory_space<vmem>>, %arg6: memref<64x8xf32, #tpu.memory_space<vmem>>, %arg7: memref<64x1xf32, #tpu.memory_space<vmem>>, %arg8: memref<1x64x256xf32, #tpu.memory_space<vmem>>) attributes {dimension_semantics = [#tpu.dimension_semantics<parallel>], iteration_bounds = array<i64: 2>, scalar_prefetch = 0 : i64, scratch_operands = 0 : i64, tpu.core_type = #tpu.core_type<tc>, window_params = [{transform_indices = @transform_0, window_bounds = array<i64: 1, 64, 256>}, {transform_indices = @transform_1, window_bounds = array<i64: 1, 64, 256>}, {transform_indices = @transform_2, window_bounds = array<i64: 1, 64, 256>}, {pipeline_mode = #tpu.pipeline_mode<synchronous>, transform_indices = @transform_3, window_bounds = array<i64: 8, 192>}, {pipeline_mode = #tpu.pipeline_mode<synchronous>, transform_indices = @transform_4, window_bounds = array<i64: 8, 1>}, {pipeline_mode = #tpu.pipeline_mode<synchronous>, transform_indices = @transform_5, window_bounds = array<i64: 64, 8>}, {pipeline_mode = #tpu.pipeline_mode<synchronous>, transform_indices = @transform_6, window_bounds = array<i64: 64, 1>}, {transform_indices = @transform_7, window_bounds = array<i64: 1, 64, 256>}]} {
    %c0 = arith.constant 0 : index
    %c0_0 = arith.constant 0 : index
    %c0_1 = arith.constant 0 : index
    %0 = vector.load %arg1[%c0, %c0_0, %c0_1] : memref<1x64x256xf32, #tpu.memory_space<vmem>>, vector<1x64x256xf32>
    %1 = vector.shape_cast %0 : vector<1x64x256xf32> to vector<64x256xf32>
    %c0_2 = arith.constant 0 : index
    %c0_3 = arith.constant 0 : index
    %c0_4 = arith.constant 0 : index
    %2 = vector.load %arg2[%c0_2, %c0_3, %c0_4] : memref<1x64x256xf32, #tpu.memory_space<vmem>>, vector<1x64x256xf32>
    %3 = vector.shape_cast %2 : vector<1x64x256xf32> to vector<64x256xf32>
    %c0_5 = arith.constant 0 : index
    %c0_6 = arith.constant 0 : index
    %c0_7 = arith.constant 0 : index
    %4 = vector.load %arg3[%c0_5, %c0_6, %c0_7] : memref<1x64x256xf32, #tpu.memory_space<vmem>>, vector<1x64x256xf32>
    %5 = vector.shape_cast %4 : vector<1x64x256xf32> to vector<64x256xf32>
    %cst = arith.constant 1.000000e+00 : f32
    %6 = vector.broadcast %cst : f32 to vector<256x1xf32>
    %cst_8 = arith.constant dense<0.000000e+00> : vector<64x1xf32>
    %7 = tpu.matmul %1, %6, %cst_8 {dimension_numbers = #tpu.dot_dimension_numbers<[1], [0], [0], [1], [0, 0, 1, 1], [], []>} : vector<64x256xf32>, vector<256x1xf32>, vector<64x1xf32> -> vector<64x1xf32>
    %cst_9 = arith.constant 3.906250e-03 : f32
    %8 = vector.broadcast %cst_9 : f32 to vector<64x1xf32>
    %9 = arith.mulf %7, %8 : vector<64x1xf32>
    %cst_10 = arith.constant dense<0.000000e+00> : vector<64x1xf32>
    %10 = tpu.matmul %3, %6, %cst_10 {dimension_numbers = #tpu.dot_dimension_numbers<[1], [0], [0], [1], [0, 0, 1, 1], [], []>} : vector<64x256xf32>, vector<256x1xf32>, vector<64x1xf32> -> vector<64x1xf32>
    %cst_11 = arith.constant 3.906250e-03 : f32
    %11 = vector.broadcast %cst_11 : f32 to vector<64x1xf32>
    %12 = arith.mulf %10, %11 : vector<64x1xf32>
    %cst_12 = arith.constant dense<0.000000e+00> : vector<64x1xf32>
    %13 = tpu.matmul %5, %6, %cst_12 {dimension_numbers = #tpu.dot_dimension_numbers<[1], [0], [0], [1], [0, 0, 1, 1], [], []>} : vector<64x256xf32>, vector<256x1xf32>, vector<64x1xf32> -> vector<64x1xf32>
    %cst_13 = arith.constant 3.906250e-03 : f32
    %14 = vector.broadcast %cst_13 : f32 to vector<64x1xf32>
    %15 = arith.mulf %13, %14 : vector<64x1xf32>
    %c0_14 = arith.constant 0 : index
    %c0_15 = arith.constant 0 : index
    %16 = vector.load %arg4[%c0_14, %c0_15] : memref<8x192xf32, #tpu.memory_space<vmem>>, vector<8x192xf32>
    %17 = vector.extract_strided_slice %16 {offsets = [0, 0], sizes = [8, 64], strides = [1, 1]} : vector<8x192xf32> to vector<8x64xf32>
    %cst_16 = arith.constant dense<0.000000e+00> : vector<8x1xf32>
    %18 = tpu.matmul %17, %9, %cst_16 {dimension_numbers = #tpu.dot_dimension_numbers<[1], [0], [0], [1], [0, 0, 1, 1], [], []>} : vector<8x64xf32>, vector<64x1xf32>, vector<8x1xf32> -> vector<8x1xf32>
    %19 = vector.extract_strided_slice %16 {offsets = [0, 64], sizes = [8, 64], strides = [1, 1]} : vector<8x192xf32> to vector<8x64xf32>
    %cst_17 = arith.constant dense<0.000000e+00> : vector<8x1xf32>
    %20 = tpu.matmul %19, %12, %cst_17 {dimension_numbers = #tpu.dot_dimension_numbers<[1], [0], [0], [1], [0, 0, 1, 1], [], []>} : vector<8x64xf32>, vector<64x1xf32>, vector<8x1xf32> -> vector<8x1xf32>
    %21 = arith.addf %18, %20 : vector<8x1xf32>
    %22 = vector.extract_strided_slice %16 {offsets = [0, 128], sizes = [8, 64], strides = [1, 1]} : vector<8x192xf32> to vector<8x64xf32>
    %cst_18 = arith.constant dense<0.000000e+00> : vector<8x1xf32>
    %23 = tpu.matmul %22, %15, %cst_18 {dimension_numbers = #tpu.dot_dimension_numbers<[1], [0], [0], [1], [0, 0, 1, 1], [], []>} : vector<8x64xf32>, vector<64x1xf32>, vector<8x1xf32> -> vector<8x1xf32>
    %24 = arith.addf %21, %23 : vector<8x1xf32>
    %c0_19 = arith.constant 0 : index
    %c0_20 = arith.constant 0 : index
    %25 = vector.load %arg5[%c0_19, %c0_20] : memref<8x1xf32, #tpu.memory_space<vmem>>, vector<8x1xf32>
    %26 = arith.addf %24, %25 : vector<8x1xf32>
    %cst_21 = arith.constant 0.000000e+00 : f32
    %27 = vector.broadcast %cst_21 : f32 to vector<8x1xf32>
    %28 = arith.cmpf ogt, %26, %27 : vector<8x1xf32>
    %cst_22 = arith.constant 0.00999999977 : f32
    %29 = vector.broadcast %cst_22 : f32 to vector<8x1xf32>
    %30 = arith.mulf %29, %26 : vector<8x1xf32>
    %31 = arith.select %28, %26, %30 : vector<8x1xi1>, vector<8x1xf32>
    %c0_23 = arith.constant 0 : index
    %c0_24 = arith.constant 0 : index
    %32 = vector.load %arg6[%c0_23, %c0_24] : memref<64x8xf32, #tpu.memory_space<vmem>>, vector<64x8xf32>
    %cst_25 = arith.constant dense<0.000000e+00> : vector<64x1xf32>
    %33 = tpu.matmul %32, %31, %cst_25 {dimension_numbers = #tpu.dot_dimension_numbers<[1], [0], [0], [1], [0, 0, 1, 1], [], []>} : vector<64x8xf32>, vector<8x1xf32>, vector<64x1xf32> -> vector<64x1xf32>
    %c0_26 = arith.constant 0 : index
    %c0_27 = arith.constant 0 : index
    %34 = vector.load %arg7[%c0_26, %c0_27] : memref<64x1xf32, #tpu.memory_space<vmem>>, vector<64x1xf32>
    %35 = arith.addf %33, %34 : vector<64x1xf32>
    %36 = arith.negf %35 : vector<64x1xf32>
    %37 = math.exp %36 : vector<64x1xf32>
    %cst_28 = arith.constant 1.000000e+00 : f32
    %38 = vector.broadcast %cst_28 : f32 to vector<64x1xf32>
    %39 = arith.addf %38, %37 : vector<64x1xf32>
    %40 = arith.divf %38, %39 : vector<64x1xf32>
    %41 = vector.broadcast %40 : vector<64x1xf32> to vector<64x256xf32>
    %42 = arith.mulf %5, %41 : vector<64x256xf32>
    %c0_29 = arith.constant 0 : index
    %c0_30 = arith.constant 0 : index
    %c0_31 = arith.constant 0 : index
    %43 = vector.load %arg8[%c0_29, %c0_30, %c0_31] : memref<1x64x256xf32, #tpu.memory_space<vmem>>, vector<1x64x256xf32>
    %44 = vector.shape_cast %43 : vector<1x64x256xf32> to vector<64x256xf32>
    %45 = vector.shape_cast %42 : vector<64x256xf32> to vector<1x64x256xf32>
    tpu.vector_store %arg8[%c0_29, %c0_30, %c0_31], %45 {strides = array<i32>} : memref<1x64x256xf32, #tpu.memory_space<vmem>>, vector<1x64x256xf32>,
    return
  }
  func.func @transform_0(%arg0: i32) -> (i32, i32, i32) {
    %c0_i32 = arith.constant 0 : i32
    %c0_i32_0 = arith.constant 0 : i32
    %c0_i32_1 = arith.constant 0 : i32
    return %arg0, %c0_i32, %c0_i32_0 : i32, i32, i32
  }
  func.func @transform_1(%arg0: i32) -> (i32, i32, i32) {
    %c0_i32 = arith.constant 0 : i32
    %c0_i32_0 = arith.constant 0 : i32
    %c0_i32_1 = arith.constant 0 : i32
    return %arg0, %c0_i32, %c0_i32_0 : i32, i32, i32
  }
  func.func @transform_2(%arg0: i32) -> (i32, i32, i32) {
    %c0_i32 = arith.constant 0 : i32
    %c0_i32_0 = arith.constant 0 : i32
    %c0_i32_1 = arith.constant 0 : i32
    return %arg0, %c0_i32, %c0_i32_0 : i32, i32, i32
  }
  func.func @transform_3(%arg0: i32) -> (i32, i32) {
    %c0_i32 = arith.constant 0 : i32
    %c0_i32_0 = arith.constant 0 : i32
    %c0_i32_1 = arith.constant 0 : i32
    return %c0_i32, %c0_i32_0 : i32, i32
  }
  func.func @transform_4(%arg0: i32) -> (i32, i32) {
    %c0_i32 = arith.constant 0 : i32
    %c0_i32_0 = arith.constant 0 : i32
    %c0_i32_1 = arith.constant 0 : i32
    return %c0_i32, %c0_i32_0 : i32, i32
  }
  func.func @transform_5(%arg0: i32) -> (i32, i32) {
    %c0_i32 = arith.constant 0 : i32
    %c0_i32_0 = arith.constant 0 : i32
    %c0_i32_1 = arith.constant 0 : i32
    return %c0_i32, %c0_i32_0 : i32, i32
  }
  func.func @transform_6(%arg0: i32) -> (i32, i32) {
    %c0_i32 = arith.constant 0 : i32
    %c0_i32_0 = arith.constant 0 : i32
    %c0_i32_1 = arith.constant 0 : i32
    return %c0_i32, %c0_i32_0 : i32, i32
  }
  func.func @transform_7(%arg0: i32) -> (i32, i32, i32) {
    %c0_i32 = arith.constant 0 : i32
    %c0_i32_0 = arith.constant 0 : i32
    %c0_i32_1 = arith.constant 0 : i32
    return %arg0, %c0_i32, %c0_i32_0 : i32, i32, i32
  }
}

</mosaic_0001>

<bundles_post_ra>
// kernel: tpu_custom_call.1
= control target key start
LH: loop header
LB: loop body
LE: loop exit
PB: predicated region body
PF: predicated region fallthrough
CT: control target
= control target key end

     0   :  { %s2657_s0 = inlined_call_operand.hbm [shape: f32[2,64,256], index: 0, kind: input, shape index: {}]   ;;  %s2658_s1 = inlined_call_operand.hbm [shape: f32[2,64,256], index: 1, kind: input, shape index: {}]   ;;  %s2659_s2 = inlined_call_operand.hbm [shape: f32[2,64,256], index: 2, kind: input, shape index: {}]   ;;  %s2660_s3 = inlined_call_operand.vmem [shape: f32[8,192], index: 3, kind: input, shape index: {}]   ;;  %s2661_s4 = inlined_call_operand.vmem [shape: f32[8,1], index: 4, kind: input, shape index: {}]   ;;  %s2662_s5 = inlined_call_operand.vmem [shape: f32[64,8], index: 5, kind: input, shape index: {}]   ;;  %s2663_s6 = inlined_call_operand.vmem [shape: f32[64,1], index: 6, kind: input, shape index: {}]   ;;  %s2664_s7 = inlined_call_operand.hbm [shape: f32[2,64,256], index: 7, kind: output, shape index: {}]  }
   0x1   :  { %2675 = sst [smem:[#allocation15_spill]] %s2657_s0 }
   0x2   :  { %2676 = sst [smem:[#allocation16_spill]] %s2658_s1 }
   0x3   :  { %12 = vsyncpa [#allocation3], 0 }
   0x4   :  { %14 = vsyncpa [#allocation3 + $0x1], 0 }
   0x5   :  { %15 = vsyncpa [#allocation6], 0 }
   0x6   :  { %17 = vsyncpa [#allocation6 + $0x1], 0 }
   0x7   :  { %18 = vsyncpa [#allocation4], 0 }
   0x8   :  { %20 = vsyncpa [#allocation4 + $0x1], 0  ;;  %s2106_s24 = smov 0   ;;  %s2108_s25 = smov 0  }
   0x9   :  { %s2110_s26 = smov 0   ;;  %s2112_s27 = smov 0  }
   0xa LB: > { %2677 = sst [smem:[#allocation12_spill]] %s2050_s27  ;;  %s2127_s28 = sadd.s32 4294967295, %s2050_s27   ;;  %s2050_s27 = sphi %s2112_s27, %s2698_s27   ;;  %s2046_s26 = sphi %s2110_s26, %s2702_s26   ;;  %s2042_s25 = sphi %s2108_s25, %s2701_s25   ;;  %s2038_s24 = sphi %s2106_s24, %s2700_s24  }
   0xb   : > { %s1386_s29 = sadd.s32 4294967294, %s2050_s27   ;;  %s2131_s30 = sadd.s32 1, %s2050_s27  }
   0xc   : > { %2678 = sst [smem:[#allocation13_spill]] %s2131_s30  ;;  %s33_s8 = sadd.s32 1, %s2046_s26 }
   0xd   : > { %s30_s9 = ssub.s32 %s2050_s27, %s2131_s30  ;;  %p40_p0 = scmp.ne.s32.totalorder %s2046_s26, %s2042_s25 }
   0xe   : > { %p31_p1 = scmp.eq.s32.totalorder %s30_s9, 0  ;;  %p41_p2 = scmp.eq.s32.totalorder %s2050_s27, 0 }
   0xf   : > { %p46_p3 = scmp.ne.s32.totalorder %s2042_s25, %s2038_s24  ;;  %p47_p4 = scmp.eq.s32.totalorder %s2127_s28, 0 }
  0x10   : > { %s2143_s10 = scalar_select %p31_p1, %s2046_s26, %s33_s8  }
  0x11   : > { %p42_p5 = por %p41_p2, %p40_p0  ;;  %p2145_p6 = por %p47_p4, %p46_p3 }
  0x12   : > { %2679 = sst [smem:[#allocation14_spill]] %s2143_s10  ;;  %p206_p7 = scmp.eq.s32.totalorder %s2127_s28, 1 }
  0x13   : > { %s2680_s11 = scalar_select %p2145_p6, 1, 0 }
  0x14   : > { %p212_p8 = scmp.eq.s32.totalorder %s1386_s29, 1  ;;  %p1812_p10 = scmp.lt.s32.totalorder %s2050_s27, 2 }
  0x15   : > { %p2152_p11 = por %p206_p7, %p40_p0  ;;  %s2665_s14 = sand.u32 1, %s2046_s26  }
  0x16   : > { %p2156_p12 = por %p212_p8, %p46_p3  ;;  %s2162_s15 = sshll.u32 %s2050_s27, 11 }
  0x17   : > { %s2681_s12 = scalar_select %p2152_p11, 1, 0 }
  0x18   : > { %s2682_s13 = scalar_select %p2156_p12, 1, 0 }
  0x19   : > { %s2166_s16 = sshll.u32 %s2665_s14, 7  ;;  %p2168_p13 = pnand %p1812_p10, %p42_p5 }
  0x1a   : > { %s265_s18 = sand.u32 1, %s2050_s27   ;;  %s2684_s1 = sld [smem:[#allocation16_spill]] }
  0x1b   : > { %s269_s22 = scalar_lea.vmem [#allocation5], %s2166_s16  ;;  %s2183_s29 = scalar_lea.sflag [#allocation6], %s265_s18 }
  0x1c   : > { %s276_s23 = sshll.u32 %s269_s22, 4  ;;  %p2189_p2 = pneg %p2168_p13  ;;  %s2180_s23 = int_to_ptr.vmem [resolvable:$true] %s276_s23 }
  0x20   : > { %s2177_s21 = scalar_lea.hbm %s2684_s1, %s2162_s15  ;;  %s1895_s22 = scalar_lea.hbm %s2684_s1, 4096 }
  0x21   : > { %s1890_s8 = scalar_lea.hbm %s2177_s21, 2048  ;;  %p1896_p5 = scmp.lt.u32.totalorder %s2177_s21, %s2684_s1 }
  0x22   : > { %p1891_p1 = scmp.ne.s32.totalorder %s2177_s21, %s1890_s8  ;;  %p1897_p7 = scmp.lt.u32.totalorder %s1895_s22, %s1890_s8 }
  0x23   : > { %p1899_p10 = scmp.lt.u32.totalorder %s1890_s8, %s2177_s21 }
  0x24   : > { %p1893_p3 = pnand %p2189_p2, %p1891_p1  ;;  %p1898_p8 = por %p1897_p7, %p1896_p5 }
  0x26   : > { %p1894_p4 = pneg %p1893_p3  ;;  %p1900_p9 = por %p1899_p10, %p1898_p8 }
  0x28   : > { %p1901_p0 = pnand %p1900_p9, %p1894_p4 }
  0x2a   : > { %1904 = shalt.err (!%p1901_p0)
}
  0x2b   : > { %s1905_s18 = scalar_lea.vmem %s2180_s23, 2048  ;;  %s2052_s19 = smov [#allocation5]  }
  0x2c   : > { %p1906_p1 = scmp.ne.s32.totalorder %s2180_s23, %s1905_s18  ;;  %s1910_s20 = sshll.u32 %s2052_s19, 4  ;;  %s1911_s20 = int_to_ptr.vmem [resolvable:$false] %s1910_s20 }
  0x2d   : > { %s1912_s10 = scalar_lea.vmem %s1911_s20, 4096  ;;  %p1913_p11 = scmp.lt.s32.totalorder %s2180_s23, %s1911_s20 }
  0x2e   : > { %p1908_p3 = pnand %p1906_p1, %p2189_p2  ;;  %p1914_p6 = scmp.lt.s32.totalorder %s1912_s10, %s1905_s18 }
  0x30   : > { %p1909_p12 = pneg %p1908_p3  ;;  %p1915_p5 = por %p1914_p6, %p1913_p11 }
  0x32   : > { %p1916_p7 = pnand %p1915_p5, %p1909_p12 }
  0x34   : > { %1919 = shalt.err (!%p1916_p7)
}
  0x35   : > { %s2668_s14 = smov 256   ;;  %s2670_s8 = smov 16  }
  0x36   : > { %1804 = dma.hbm_to_vmem [thread:$0]  (!%p2168_p13), %s2177_s21, 2048, %s2180_s23, %s2183_s29, %s2668_s14, %s2668_s14, %s2670_s8  }
  0x37   : > { %p305_p6 = scmp.lt.s32.totalorder %s2050_s27, 3  ;;  %s2686_s0 = sld [smem:[#allocation15_spill]] }
  0x38   : > { %p2687_p9 = scmp.ge.s32.totalorder %s2050_s27, 1  ;;  %s248_s10 = scalar_lea.vmem [#allocation2], %s2166_s16 }
  0x39   : > { %s255_s1 = sshll.u32 %s248_s10, 4  ;;  %s2689_s21 = sand.u32 1, %s2046_s26   ;;  %s2230_s1 = int_to_ptr.vmem [resolvable:$true] %s255_s1 }
  0x3a   : > { %p2225_p11 = pnand %p2687_p9, %p305_p6  ;;  %s2234_s23 = scalar_lea.sflag [#allocation3], %s2689_s21 }
  0x3c   : > { %s2688_s20 = scalar_select %p2225_p11, 1, 0 }
  0x3d   : > { %s2221_s19 = scalar_lea.hbm %s2686_s0, %s2162_s15  ;;  %s1925_s8 = scalar_lea.hbm %s2686_s0, 4096 }
  0x3e   : > { %s1920_s14 = scalar_lea.hbm %s2221_s19, 2048  ;;  %p1926_p8 = scmp.lt.u32.totalorder %s2221_s19, %s2686_s0 }
  0x3f   : > { %p1921_p12 = scmp.ne.s32.totalorder %s2221_s19, %s1920_s14  ;;  %p1927_p10 = scmp.lt.u32.totalorder %s1925_s8, %s1920_s14 }
  0x40   : > { %p1929_p3 = scmp.lt.u32.totalorder %s1920_s14, %s2221_s19 }
  0x41   : > { %p1923_p0 = pnand %p1921_p12, %p2189_p2  ;;  %p1928_p1 = por %p1927_p10, %p1926_p8 }
  0x43   : > { %p1924_p4 = pneg %p1923_p0  ;;  %p1930_p5 = por %p1929_p3, %p1928_p1 }
  0x45   : > { %p1931_p7 = pnand %p1930_p5, %p1924_p4 }
  0x47   : > { %1934 = shalt.err (!%p1931_p7)
}
  0x48   : > { %s1935_s10 = scalar_lea.vmem %s2230_s1, 2048  ;;  %s2055_s21 = smov [#allocation2]  }
  0x49   : > { %p1936_p6 = scmp.ne.s32.totalorder %s2230_s1, %s1935_s10  ;;  %s1940_s22 = sshll.u32 %s2055_s21, 4  ;;  %s1941_s22 = int_to_ptr.vmem [resolvable:$false] %s1940_s22 }
  0x4a   : > { %s1942_s27 = scalar_lea.vmem %s1941_s22, 4096  ;;  %p1943_p0 = scmp.lt.s32.totalorder %s2230_s1, %s1941_s22 }
  0x4b   : > { %p1938_p9 = pnand %p1936_p6, %p2189_p2  ;;  %p1944_p11 = scmp.lt.s32.totalorder %s1942_s27, %s1935_s10 }
  0x4d   : > { %p1939_p12 = pneg %p1938_p9  ;;  %p1945_p8 = por %p1944_p11, %p1943_p0 }
  0x4f   : > { %p1946_p10 = pnand %p1945_p8, %p1939_p12 }
  0x51   : > { %1949 = shalt.err (!%p1946_p10)
}
  0x52   : > { %s2690_s30 = smov 16   ;;  %s2691_s14 = smov 256  }
  0x53   : > { %1801 = dma.hbm_to_vmem [thread:$0]  (!%p2168_p13), %s2221_s19, 2048, %s2230_s1, %s2234_s23, %s2691_s14, %s2691_s14, %s2690_s30  }
  0x54   : > { %s2265_s21 = scalar_lea.hbm %s2659_s2, %s2162_s15  ;;  %s290_s10 = scalar_lea.vmem [#allocation7], %s2166_s16 }
  0x55   : > { %s297_s22 = sshll.u32 %s290_s10, 4  ;;  %s1950_s27 = scalar_lea.hbm %s2265_s21, 2048  ;;  %s2268_s22 = int_to_ptr.vmem [resolvable:$true] %s297_s22 }
  0x56   : > { %p1951_p11 = scmp.ne.s32.totalorder %s2265_s21, %s1950_s27  ;;  %s1955_s19 = scalar_lea.hbm %s2659_s2, 4096 }
  0x57   : > { %p1956_p3 = scmp.lt.u32.totalorder %s2265_s21, %s2659_s2  ;;  %p1957_p5 = scmp.lt.u32.totalorder %s1955_s19, %s1950_s27 }
  0x58   : > { %p1953_p4 = pnand %p1951_p11, %p2189_p2  ;;  %p1959_p6 = scmp.lt.u32.totalorder %s1950_s27, %s2265_s21 }
  0x59   : > { %p1958_p7 = por %p1957_p5, %p1956_p3 }
  0x5a   : > { %p1954_p1 = pneg %p1953_p4 }
  0x5b   : > { %p1960_p9 = por %p1959_p6, %p1958_p7 }
  0x5d   : > { %p1961_p12 = pnand %p1960_p9, %p1954_p1 }
  0x5f   : > { %1964 = shalt.err (!%p1961_p12)
}
  0x60   : > { %s1965_s16 = scalar_lea.vmem %s2268_s22, 2048  ;;  %s2056_s0 = smov [#allocation7]  }
  0x61   : > { %p1966_p0 = scmp.ne.s32.totalorder %s2268_s22, %s1965_s16  ;;  %s1970_s8 = sshll.u32 %s2056_s0, 4  ;;  %s1971_s8 = int_to_ptr.vmem [resolvable:$false] %s1970_s8 }
  0x62   : > { %s1972_s18 = scalar_lea.vmem %s1971_s8, 4096  ;;  %p1973_p11 = scmp.lt.s32.totalorder %s2268_s22, %s1971_s8 }
  0x63   : > { %p1968_p8 = pnand %p1966_p0, %p2189_p2  ;;  %p1974_p4 = scmp.lt.s32.totalorder %s1972_s18, %s1965_s16 }
  0x65   : > { %p1969_p10 = pneg %p1968_p8  ;;  %p1975_p3 = por %p1974_p4, %p1973_p11 }
  0x67   : > { %p1976_p5 = pnand %p1975_p3, %p1969_p10 }
  0x69   : > { %1979 = shalt.err (!%p1976_p5)
}
  0x6a   : > { %1807 = dma.hbm_to_vmem [thread:$0]  (!%p2168_p13), %s2265_s21, 2048, %s2268_s22, %s2183_s29, %s2691_s14, %s2691_s14, %s2690_s30  }
  0x6b   : > { %p2692_p2 = scmp.ne.s32.totalorder %s2688_s20, 0 }
  0x6c   : > { %s2298_s9 = sand.u32 (!%p2692_p2), 1, %s2042_s25   ;;  %p2693_p1 = scmp.ne.s32.totalorder (!%p2692_p2), %s2680_s11, 0 }
  0x6d   : > { %309 = sbr.rel (%p2692_p2) target bundleno = 1057 (0x421), region = 48  ;;  %s2301_s10 = sshll.u32 (!%p2692_p2), %s2298_s9, 7 }
  0x6e   : > { %s312_s17 = scalar_lea.sflag (!%p2692_p2), [#allocation3], %s2298_s9  ;;  %s2305_s27 = scalar_lea.vmem (!%p2692_p2), [#allocation2], %s2301_s10 }
  0x74   : > { %2025 = dma.done.wait (%p2693_p1), %s312_s17, 2048  }
  0x75   : > { %2027 = vsyncadd (%p2693_p1), %s312_s17, 4294965248  ;;  %s320_s29 = sand.u32 1, %s2127_s28   ;;  %s2313_s30 = scalar_lea.vmem [#allocation5], %s2301_s10 }
  0x76   : > { %s321_s20 = scalar_lea.sflag [#allocation6], %s320_s29 }
  0x77   : > { %2029 = dma.done.wait (%p2693_p1), %s321_s20, 4096  }
  0x78   : > { %2031 = vsyncadd (%p2693_p1), %s321_s20, 4294963200  ;;  %v2057_v0 = vmov 1.0|1.0   ;;  %v375_v1 = vld [vmem:[%s2305_s27 + $0x8] sm:$0xff]  ;;  %v2350_v3 = vld [vmem:[%s2660_s3] sm:$0xff]  ;;  %s2058_s21 = smov 64  }
  0x79   : > { %1706 = vmatprep.subr.bf16.mxu0 %v2057_v0  ;;  %1722 = vmatprep.subr.bf16.mxu1 %v2057_v0  ;;  %v391_v2 = vld [vmem:[%s2313_s30 + $0x8] sm:$0xff]  ;;  %v374_v4 = vld [vmem:[%s2305_s27] sm:$0xff]  ;;  %v377_v6 = vld [vmem:[%s2305_s27 + $0x18] sm:$0xff]  ;;  %s2405_s22 = scalar_lea.vmem [#allocation7], %s2301_s10  ;;  %v2059_v50 = vmov 0.0|0.0   ;;  %vm2060_vm0 = vmmov 0  }
  0x7a   : > { %1707 = vmatpush3.bf16.msra.mxu0 %v2057_v0  ;;  %1723 = vmatpush3.bf16.msra.mxu1 %v2057_v0  ;;  %v390_v5 = vld [vmem:[%s2313_s30] sm:$0xff]  ;;  %v393_v7 = vld [vmem:[%s2313_s30 + $0x18] sm:$0xff]  ;;  %v376_v8 = vld [vmem:[%s2305_s27 + $0x10] sm:$0xff]  ;;  %v2061_v51 = vmov 0.0   ;;  %vm766_vm1 = vcmask 523264   ;;  %vm1006_vm2 = vcmask 64512  }
  0x7b   : > { %1708 = vmatprep.subr.bf16.mxu0 %v2057_v0  ;;  %1724 = vmatprep.subr.bf16.mxu1 %v2057_v0  ;;  %v392_v9 = vld [vmem:[%s2313_s30 + $0x10] sm:$0xff]  ;;  %v379_v10 = vld [vmem:[%s2305_s27 + $0x28] sm:$0xff]  ;;  %v378_v12 = vld [vmem:[%s2305_s27 + $0x20] sm:$0xff]  ;;  %s2576_s23 = scalar_lea.vmem [#allocation8], %s2301_s10  ;;  %s1430_s10 = sshll.u32 %s2127_s28, 11 }
  0x7c   : > { %486 = vmatprep.mubr.f32.mxu0 %v375_v1  ;;  %599 = vmatprep.mubr.f32.mxu1 %v391_v2  ;;  %v395_v11 = vld [vmem:[%s2313_s30 + $0x28] sm:$0xff]  ;;  %v394_v13 = vld [vmem:[%s2313_s30 + $0x20] sm:$0xff]  ;;  %v381_v14 = vld [vmem:[%s2305_s27 + $0x38] sm:$0xff]  ;;  %s1270_s15 = sshll.u32 %s2576_s23, 4  ;;  %s2605_s8 = scalar_lea.hbm %s2664_s7, %s1430_s10  ;;  %s2607_s15 = int_to_ptr.vmem [resolvable:$true] %s1270_s15 }
  0x7d   : > { %764 = vrot.lane.b32.xlu0 %v2350_v3, %s2058_s21  ;;  %v397_v15 = vld [vmem:[%s2313_s30 + $0x38] sm:$0xff]  ;;  %v380_v16 = vld [vmem:[%s2305_s27 + $0x30] sm:$0xff]  ;;  %v383_v18 = vld [vmem:[%s2305_s27 + $0x48] sm:$0xff]  ;;  %s1257_s28 = scalar_lea.sflag [#allocation4], %s2298_s9  ;;  %s1980_s18 = scalar_lea.vmem %s2607_s15, 2048 }
  0x7e   : > { %1709 = vmatpush3.bf16.msra.mxu0 %v2057_v0  ;;  %1725 = vmatpush3.bf16.msra.mxu1 %v2057_v0  ;;  %v396_v17 = vld [vmem:[%s2313_s30 + $0x30] sm:$0xff]  ;;  %v399_v19 = vld [vmem:[%s2313_s30 + $0x48] sm:$0xff]  ;;  %v382_v20 = vld [vmem:[%s2305_s27 + $0x40] sm:$0xff]  ;;  %p1981_p13 = scmp.ne.s32.totalorder %s2607_s15, %s1980_s18  ;;  %p2694_p7 = scmp.ne.s32.totalorder %s2681_s12, 0 }
  0x7f   : > { %1710 = vmatprep.subr.bf16.mxu0 %v2057_v0  ;;  %1726 = vmatprep.subr.bf16.mxu1 %v2057_v0  ;;  %v398_v21 = vld [vmem:[%s2313_s30 + $0x40] sm:$0xff]  ;;  %v385_v22 = vld [vmem:[%s2305_s27 + $0x58] sm:$0xff]  ;;  %v384_v24 = vld [vmem:[%s2305_s27 + $0x50] sm:$0xff]  ;;  %s2063_s17 = smov [#allocation8]  }
  0x80   : > { %v401_v23 = vld [vmem:[%s2313_s30 + $0x58] sm:$0xff]  ;;  %v400_v25 = vld [vmem:[%s2313_s30 + $0x50] sm:$0xff]  ;;  %v387_v26 = vld [vmem:[%s2305_s27 + $0x68] sm:$0xff]  ;;  %p1982_p6 = pnand %p1981_p13, %p2694_p7 }
  0x81   : > { %v403_v27 = vld [vmem:[%s2313_s30 + $0x68] sm:$0xff]  ;;  %v386_v28 = vld [vmem:[%s2305_s27 + $0x60] sm:$0xff]  ;;  %v389_v30 = vld [vmem:[%s2305_s27 + $0x78] sm:$0xff] }
  0x82   : > { %1711 = vmatpush3.bf16.msra.mxu0 %v2057_v0  ;;  %1727 = vmatpush3.bf16.msra.mxu1 %v2057_v0  ;;  %v402_v29 = vld [vmem:[%s2313_s30 + $0x60] sm:$0xff]  ;;  %v405_v31 = vld [vmem:[%s2313_s30 + $0x78] sm:$0xff]  ;;  %v388_v32 = vld [vmem:[%s2305_s27 + $0x70] sm:$0xff]  ;;  %p1983_p9 = pneg %p1982_p6  ;;  %s1984_s27 = sshll.u32 %s2063_s17, 4  ;;  %s1985_s27 = int_to_ptr.vmem [resolvable:$false] %s1984_s27 }
  0x83   : > { %1712 = vmatprep.subr.bf16.mxu0 %v2057_v0  ;;  %1728 = vmatprep.subr.bf16.mxu1 %v2057_v0  ;;  %v404_v33 = vld [vmem:[%s2313_s30 + $0x70] sm:$0xff]  ;;  %v2408_v34 = vld [vmem:[%s2405_s22 + $0x8] sm:$0xff]  ;;  %v2413_v35 = vld [vmem:[%s2405_s22] sm:$0xff]  ;;  %s1986_s29 = scalar_lea.vmem %s1985_s27, 4096  ;;  %p1987_p12 = scmp.lt.s32.totalorder %s2607_s15, %s1985_s27 }
  0x84   : > { %v2416_v36 = vld [vmem:[%s2405_s22 + $0x18] sm:$0xff]  ;;  %v2421_v37 = vld [vmem:[%s2405_s22 + $0x10] sm:$0xff]  ;;  %v2424_v38 = vld [vmem:[%s2405_s22 + $0x28] sm:$0xff]  ;;  %p1988_p0 = scmp.lt.s32.totalorder %s1986_s29, %s1980_s18 }
  0x85   : > { %v2429_v39 = vld [vmem:[%s2405_s22 + $0x20] sm:$0xff]  ;;  %v2432_v40 = vld [vmem:[%s2405_s22 + $0x38] sm:$0xff]  ;;  %v2437_v41 = vld [vmem:[%s2405_s22 + $0x30] sm:$0xff] }
  0x86   : > { %1713 = vmatpush3.bf16.msra.mxu0 %v2057_v0  ;;  %1729 = vmatpush3.bf16.msra.mxu1 %v2057_v0  ;;  %v2440_v42 = vld [vmem:[%s2405_s22 + $0x48] sm:$0xff]  ;;  %v2445_v43 = vld [vmem:[%s2405_s22 + $0x40] sm:$0xff]  ;;  %v2448_v44 = vld [vmem:[%s2405_s22 + $0x58] sm:$0xff]  ;;  %p1989_p8 = por %p1988_p0, %p1987_p12 }
  0x87   : > { %1714 = vmatprep.subr.bf16.mxu0 %v2057_v0  ;;  %1730 = vmatprep.subr.bf16.mxu1 %v2057_v0  ;;  %v2453_v45 = vld [vmem:[%s2405_s22 + $0x50] sm:$0xff]  ;;  %v2456_v46 = vld [vmem:[%s2405_s22 + $0x68] sm:$0xff]  ;;  %v2461_v47 = vld [vmem:[%s2405_s22 + $0x60] sm:$0xff] }
  0x88   : > { %v2464_v48 = vld [vmem:[%s2405_s22 + $0x78] sm:$0xff]  ;;  %v2469_v49 = vld [vmem:[%s2405_s22 + $0x70] sm:$0xff]  ;;  %p1990_p10 = pnand %p1989_p8, %p1983_p9 }
  0x8a   : > { %1715 = vmatpush3.bf16.msra.mxu0 %v2057_v0  ;;  %1731 = vmatpush3.bf16.msra.mxu1 %v2057_v0 }
  0x8b   : > { %1716 = vmatprep.subr.bf16.mxu0 %v2057_v0  ;;  %1732 = vmatprep.subr.bf16.mxu1 %v2057_v0 }
  0x8e   : > { %1717 = vmatpush3.bf16.msra.mxu0 %v2057_v0  ;;  %1733 = vmatpush3.bf16.msra.mxu1 %v2057_v0 }
  0x8f   : > { %1718 = vmatprep.subr.bf16.mxu0 %v2057_v0  ;;  %1734 = vmatprep.subr.bf16.mxu1 %v2057_v0 }
  0x92   : > { %1719 = vmatpush3.bf16.msra.mxu0 %v2057_v0  ;;  %1735 = vmatpush3.bf16.msra.mxu1 %v2057_v0 }
  0x93   : > { %1720 = vmatprep.subr.bf16.mxu0 %v2057_v0  ;;  %1736 = vmatprep.subr.bf16.mxu1 %v2057_v0 }
  0x96   : > { %1721 = vmatpush3.bf16.msra.mxu0 %v2057_v0  ;;  %1737 = vmatpush3.bf16.msra.mxu1 %v2057_v0 }
  0x97   : > { %1738 = vmatprep.subr.bf16.mxu0 %v2057_v0  ;;  %1754 = vmatprep.subr.bf16.mxu1 %v2059_v50 }
  0x99   : > { %487 = vmatmul.mubr.f32.vlgmr.msra.gmra.mrb[0].mxu0 %v374_v4  ;;  %600 = vmatmul.mubr.f32.vlgmr.msra.gmra.mrb[0].mxu1 %v390_v5 }
  0x9a   : > { %1739 = vmatpush3.bf16.msra.mxu0 %v2057_v0  ;;  %491 = vmatprep.mubr.f32.mxu0 %v377_v6 }
  0x9b   : > { %604 = vmatprep.mubr.f32.mxu1 %v393_v7  ;;  %1740 = vmatprep.subr.bf16.mxu0 %v2057_v0 }
  0x9d   : > { %492 = vmatmul.mubr.f32.gmra.mrb[2].mxu0 %v376_v8  ;;  %605 = vmatmul.mubr.f32.gmra.mrb[2].mxu1 %v392_v9 }
  0x9e   : > { %1741 = vmatpush3.bf16.msra.mxu0 %v2057_v0  ;;  %496 = vmatprep.mubr.f32.mxu0 %v379_v10 }
  0x9f   : > { %609 = vmatprep.mubr.f32.mxu1 %v395_v11  ;;  %1742 = vmatprep.subr.bf16.mxu0 %v2057_v0 }
  0xa1   : > { %497 = vmatmul.mubr.f32.gmra.mrb[4].mxu0 %v378_v12  ;;  %610 = vmatmul.mubr.f32.gmra.mrb[4].mxu1 %v394_v13 }
  0xa2   : > { %1743 = vmatpush3.bf16.msra.mxu0 %v2057_v0  ;;  %501 = vmatprep.mubr.f32.mxu0 %v381_v14 }
  0xa3   : > { %614 = vmatprep.mubr.f32.mxu1 %v397_v15  ;;  %1744 = vmatprep.subr.bf16.mxu0 %v2057_v0 }
  0xa5   : > { %502 = vmatmul.mubr.f32.gmra.mrb[6].mxu0 %v380_v16  ;;  %615 = vmatmul.mubr.f32.gmra.mrb[6].mxu1 %v396_v17 }
  0xa6   : > { %1745 = vmatpush3.bf16.msra.mxu0 %v2057_v0  ;;  %506 = vmatprep.mubr.f32.mxu0 %v383_v18 }
  0xa7   : > { %619 = vmatprep.mubr.f32.mxu1 %v399_v19  ;;  %1746 = vmatprep.subr.bf16.mxu0 %v2057_v0 }
  0xa9   : > { %507 = vmatmul.mubr.f32.gmra.mrb[8].mxu0 %v382_v20  ;;  %620 = vmatmul.mubr.f32.gmra.mrb[8].mxu1 %v398_v21 }
  0xaa   : > { %1747 = vmatpush3.bf16.msra.mxu0 %v2057_v0  ;;  %511 = vmatprep.mubr.f32.mxu0 %v385_v22 }
  0xab   : > { %624 = vmatprep.mubr.f32.mxu1 %v401_v23  ;;  %1748 = vmatprep.subr.bf16.mxu0 %v2057_v0 }
  0xad   : > { %512 = vmatmul.mubr.f32.gmra.mrb[10].mxu0 %v384_v24  ;;  %625 = vmatmul.mubr.f32.gmra.mrb[10].mxu1 %v400_v25 }
  0xae   : > { %1749 = vmatpush3.bf16.msra.mxu0 %v2057_v0  ;;  %516 = vmatprep.mubr.f32.mxu0 %v387_v26 }
  0xaf   : > { %629 = vmatprep.mubr.f32.mxu1 %v403_v27  ;;  %1750 = vmatprep.subr.bf16.mxu0 %v2057_v0 }
  0xb1   : > { %517 = vmatmul.mubr.f32.gmra.mrb[12].mxu0 %v386_v28  ;;  %630 = vmatmul.mubr.f32.gmra.mrb[12].mxu1 %v402_v29 }
  0xb2   : > { %1751 = vmatpush3.bf16.msra.mxu0 %v2057_v0  ;;  %521 = vmatprep.mubr.f32.mxu0 %v389_v30 }
  0xb3   : > { %634 = vmatprep.mubr.f32.mxu1 %v405_v31  ;;  %1752 = vmatprep.subr.bf16.mxu0 %v2057_v0 }
  0xb5   : > { %522 = vmatmul.mubr.f32.gmra.mrb[14].mxu0 %v388_v32  ;;  %635 = vmatmul.mubr.f32.gmra.mrb[14].mxu1 %v404_v33 }
  0xb6   : > { %1753 = vmatpush3.bf16.msra.mxu0 %v2057_v0  ;;  %712 = vmatprep.mubr.f32.mxu0 %v2408_v34 }
  0xb7   : > { %1778 = vmatprep.subr.bf16.mxu0 %v2059_v50  ;;  %1651 = vmatprep.mubr.msk.f32.mxu1 %vm2060_vm0, %v2061_v51 }
  0xb9   : > { %713 = vmatmul.mubr.f32.vlgmr.msra.gmra.mrb[16].mxu0 %v2413_v35 }
  0xba   : > { %717 = vmatprep.mubr.f32.mxu0 %v2416_v36 }
  0xbd   : > { %718 = vmatmul.mubr.f32.gmra.mrb[18].mxu0 %v2421_v37 }
  0xbe   : > { %722 = vmatprep.mubr.f32.mxu0 %v2424_v38 }
  0xc1   : > { %723 = vmatmul.mubr.f32.gmra.mrb[20].mxu0 %v2429_v39 }
  0xc2   : > { %727 = vmatprep.mubr.f32.mxu0 %v2432_v40 }
  0xc5   : > { %728 = vmatmul.mubr.f32.gmra.mrb[22].mxu0 %v2437_v41 }
  0xc6   : > { %732 = vmatprep.mubr.f32.mxu0 %v2440_v42 }
  0xc9   : > { %733 = vmatmul.mubr.f32.gmra.mrb[24].mxu0 %v2445_v43 }
  0xca   : > { %737 = vmatprep.mubr.f32.mxu0 %v2448_v44 }
  0xcd   : > { %738 = vmatmul.mubr.f32.gmra.mrb[26].mxu0 %v2453_v45 }
  0xce   : > { %742 = vmatprep.mubr.f32.mxu0 %v2456_v46 }
  0xd1   : > { %743 = vmatmul.mubr.f32.gmra.mrb[28].mxu0 %v2461_v47 }
  0xd2   : > { %747 = vmatprep.mubr.f32.mxu0 %v2464_v48 }
  0xd5   : > { %748 = vmatmul.mubr.f32.gmra.mrb[30].mxu0 %v2469_v49 }
  0xd6   : > { %1689 = vmatprep.mubr.msk.f32.mxu0 %vm2060_vm0, %v2061_v51 }
 0x16c   : > { %v1463_v52 = vpop.f32.mrb[0].mxu0  ;;  %v1519_v53 = vpop.f32.mrb[0].mxu1 }
 0x16d   : > { %v1464_v54 = vpop.f32.mrb[1].mxu0  ;;  %v1520_v55 = vpop.f32.mrb[1].mxu1 }
 0x16e   : > { %v1465_v56 = vadd.f32 %v1464_v54, %v1463_v52  ;;  %v1521_v57 = vadd.f32 %v1520_v55, %v1519_v53 }
 0x170   : > { %v1466_v58 = vpop.f32.mrb[2].mxu0  ;;  %v1522_v59 = vpop.f32.mrb[2].mxu1  ;;  %v640_v63 = vmul.f32 0.00390625, %v1521_v57  ;;  %v2478_v1 = vmul.f32 0.00390625, %v1465_v56 }
 0x171   : > { %v1467_v60 = vpop.f32.mrb[3].mxu0  ;;  %v1523_v61 = vpop.f32.mrb[3].mxu1 }
 0x172   : > { %v1468_v62 = vadd.f32 %v1467_v60, %v1466_v58  ;;  %v1524_v0 = vadd.f32 %v1523_v61, %v1522_v59 }
 0x174   : > { %v2480_v2 = vmul.f32 0.00390625, %v1468_v62  ;;  %v1469_v4 = vpop.f32.mrb[4].mxu0  ;;  %v641_v5 = vmul.f32 0.00390625, %v1524_v0  ;;  %v1525_v6 = vpop.f32.mrb[4].mxu1 }
 0x175   : > { %v1470_v7 = vpop.f32.mrb[5].mxu0  ;;  %v1526_v8 = vpop.f32.mrb[5].mxu1 }
 0x176   : > { %v1767_v9 = vpack.c.bf16 %v2480_v2, %v2478_v1  ;;  %v1471_v10 = vadd.f32 %v1470_v7, %v1469_v4  ;;  %v1755_v11 = vpack.c.bf16 %v641_v5, %v640_v63  ;;  %v1527_v12 = vadd.f32 %v1526_v8, %v1525_v6 }
 0x178   : > { %v1472_v13 = vpop.f32.mrb[6].mxu0  ;;  %v1528_v14 = vpop.f32.mrb[6].mxu1  ;;  %1756 = vmatpush3.bf16.msra.mxu1 %v1755_v11  ;;  %v642_v18 = vmul.f32 0.00390625, %v1527_v12  ;;  %v2485_v20 = vmul.f32 0.00390625, %v1471_v10 }
 0x179   : > { %v1473_v15 = vpop.f32.mrb[7].mxu0  ;;  %v1529_v16 = vpop.f32.mrb[7].mxu1  ;;  %1757 = vmatprep.subr.bf16.mxu1 %v2059_v50 }
 0x17a   : > { %v1474_v17 = vadd.f32 %v1473_v15, %v1472_v13  ;;  %v1530_v19 = vadd.f32 %v1529_v16, %v1528_v14 }
 0x17c   : > { %v2487_v21 = vmul.f32 0.00390625, %v1474_v17  ;;  %v1475_v22 = vpop.f32.mrb[8].mxu0  ;;  %v643_v23 = vmul.f32 0.00390625, %v1530_v19  ;;  %v1531_v24 = vpop.f32.mrb[8].mxu1 }
 0x17d   : > { %v1476_v25 = vpop.f32.mrb[9].mxu0  ;;  %v1532_v26 = vpop.f32.mrb[9].mxu1 }
 0x17e   : > { %v1770_v27 = vpack.c.bf16 %v2487_v21, %v2485_v20  ;;  %v1477_v28 = vadd.f32 %v1476_v25, %v1475_v22  ;;  %v1758_v29 = vpack.c.bf16 %v643_v23, %v642_v18  ;;  %v1533_v30 = vadd.f32 %v1532_v26, %v1531_v24  ;;  %v765_v23 = vpop.permute.xlu0 %764 }
 0x180   : > { %v1478_v31 = vpop.f32.mrb[10].mxu0  ;;  %v1534_v32 = vpop.f32.mrb[10].mxu1  ;;  %1759 = vmatpush3.bf16.msra.mxu1 %v1758_v29  ;;  %v644_v54 = vmul.f32 0.00390625, %v1533_v30  ;;  %v531_v56 = vmul.f32 0.00390625, %v1477_v28 }
 0x181   : > { %v1479_v33 = vpop.f32.mrb[11].mxu0  ;;  %v1535_v52 = vpop.f32.mrb[11].mxu1  ;;  %1760 = vmatprep.subr.bf16.mxu1 %v2059_v50 }
 0x182   : > { %v1480_v53 = vadd.f32 %v1479_v33, %v1478_v31  ;;  %v1536_v55 = vadd.f32 %v1535_v52, %v1534_v32 }
 0x184   : > { %v532_v57 = vmul.f32 0.00390625, %v1480_v53  ;;  %v1481_v58 = vpop.f32.mrb[12].mxu0  ;;  %v645_v59 = vmul.f32 0.00390625, %v1536_v55  ;;  %v1537_v60 = vpop.f32.mrb[12].mxu1 }
 0x185   : > { %v1482_v61 = vpop.f32.mrb[13].mxu0  ;;  %v1538_v62 = vpop.f32.mrb[13].mxu1 }
 0x186   : > { %v1773_v63 = vpack.c.bf16 %v532_v57, %v531_v56  ;;  %v1483_v0 = vadd.f32 %v1482_v61, %v1481_v58  ;;  %v1761_v4 = vpack.c.bf16 %v645_v59, %v644_v54  ;;  %v1539_v5 = vadd.f32 %v1538_v62, %v1537_v60 }
 0x188   : > { %v1484_v6 = vpop.f32.mrb[14].mxu0  ;;  %v1540_v7 = vpop.f32.mrb[14].mxu1  ;;  %1762 = vmatpush3.bf16.msra.mxu1 %v1761_v4  ;;  %v646_v11 = vmul.f32 0.00390625, %v1539_v5  ;;  %v533_v14 = vmul.f32 0.00390625, %v1483_v0 }
 0x189   : > { %v1485_v8 = vpop.f32.mrb[15].mxu0  ;;  %v1541_v10 = vpop.f32.mrb[15].mxu1  ;;  %1763 = vmatprep.subr.bf16.mxu1 %v2059_v50 }
 0x18a   : > { %v1486_v12 = vadd.f32 %v1485_v8, %v1484_v6  ;;  %v1542_v13 = vadd.f32 %v1541_v10, %v1540_v7  ;;  %v990_v10 = vld [vmem:[%s2662_s5] sm:$0xff] }
 0x18c   : > { %v534_v15 = vmul.f32 0.00390625, %v1486_v12  ;;  %v647_v16 = vmul.f32 0.00390625, %v1542_v13  ;;  %v1575_v17 = vpop.f32.mrb[16].mxu0 }
 0x18d   : > { %v1576_v18 = vpop.f32.mrb[17].mxu0 }
 0x18e   : > { %v1776_v19 = vpack.c.bf16 %v534_v15, %v533_v14  ;;  %v1764_v20 = vpack.c.bf16 %v647_v16, %v646_v11  ;;  %v1577_v21 = vadd.f32 %v1576_v18, %v1575_v17  ;;  %v985_v16 = vld [vmem:[%s2661_s4] sm:$0xff] }
 0x190   : > { %v1578_v22 = vpop.f32.mrb[18].mxu0  ;;  %1765 = vmatpush3.bf16.msra.mxu1 %v1764_v20  ;;  %v753_v26 = vmul.f32 0.00390625, %v1577_v21 }
 0x191   : > { %v1579_v24 = vpop.f32.mrb[19].mxu0  ;;  %1766 = vmatprep.subr.bf16.mxu1 %v2059_v50 }
 0x192   : > { %v1580_v25 = vadd.f32 %v1579_v24, %v1578_v22  ;;  %v991_v22 = vld [vmem:[%s2662_s5 + $0x8] sm:$0xff]  ;;  %v993_v24 = vld [vmem:[%s2662_s5 + $0x18] sm:$0xff] }
 0x193   : > { %1652 = vmatmul.mubr.msk.f32.vlgmr.msra.gmra.mrb[16].mxu1 %vm766_vm1, %v765_v23  ;;  %v992_v23 = vld [vmem:[%s2662_s5 + $0x10] sm:$0xff] }
 0x194   : > { %v754_v28 = vmul.f32 0.00390625, %v1580_v25  ;;  %v1581_v29 = vpop.f32.mrb[20].mxu0  ;;  %1768 = vmatpush3.bf16.msra.mxu1 %v1767_v9  ;;  %1670 = vmatprep.mubr.msk.f32.mxu1 %vm2060_vm0, %v2061_v51  ;;  %v994_v25 = vld [vmem:[%s2662_s5 + $0x20] sm:$0xff] }
 0x195   : > { %v1582_v30 = vpop.f32.mrb[21].mxu0  ;;  %1769 = vmatprep.subr.bf16.mxu1 %v2059_v50 }
 0x196   : > { %v1779_v31 = vpack.c.bf16 %v754_v28, %v753_v26  ;;  %v1583_v32 = vadd.f32 %v1582_v30, %v1581_v29  ;;  %v995_v26 = vld [vmem:[%s2662_s5 + $0x28] sm:$0xff]  ;;  %v996_v28 = vld [vmem:[%s2662_s5 + $0x30] sm:$0xff]  ;;  %v997_v29 = vld [vmem:[%s2662_s5 + $0x38] sm:$0xff]  ;;  %v2062_v30 = vmov 0  }
 0x197   : > { %1856 = vset.pattern.permute.xlu1 %v2062_v30  ;;  %1857 = vset.pattern.permute.xlu0 %v2062_v30 }
 0x198   : > { %v1584_v33 = vpop.f32.mrb[22].mxu0  ;;  %1771 = vmatpush3.bf16.msra.mxu1 %v1770_v27  ;;  %1780 = vmatpush3.bf16.msra.mxu0 %v1779_v31  ;;  %v755_v54 = vmul.f32 0.00390625, %v1583_v32  ;;  %v999_v31 = vld [vmem:[%s2663_s6 + $0x8] sm:$0xff]  ;;  %v998_v32 = vld [vmem:[%s2663_s6] sm:$0xff] }
 0x199   : > { %v1585_v52 = vpop.f32.mrb[23].mxu0  ;;  %1772 = vmatprep.subr.bf16.mxu1 %v2059_v50  ;;  %1781 = vmatprep.subr.bf16.mxu0 %v2059_v50 }
 0x19a   : > { %v1586_v53 = vadd.f32 %v1585_v52, %v1584_v33 }
 0x19c   : > { %v756_v1 = vmul.f32 0.00390625, %v1586_v53  ;;  %v1587_v2 = vpop.f32.mrb[24].mxu0  ;;  %1774 = vmatpush3.bf16.msra.mxu1 %v1773_v63 }
 0x19d   : > { %v1588_v9 = vpop.f32.mrb[25].mxu0  ;;  %1775 = vmatprep.subr.bf16.mxu1 %v2059_v50 }
 0x19e   : > { %v1782_v51 = vpack.c.bf16 %v756_v1, %v755_v54  ;;  %v1589_v55 = vadd.f32 %v1588_v9, %v1587_v2  ;;  %v1001_v1 = vld [vmem:[%s2663_s6 + $0x18] sm:$0xff]  ;;  %v1000_v9 = vld [vmem:[%s2663_s6 + $0x10] sm:$0xff] }
 0x1a0   : > { %v1590_v56 = vpop.f32.mrb[26].mxu0  ;;  %1777 = vmatpush3.bf16.msra.mxu1 %v1776_v19  ;;  %1783 = vmatpush3.bf16.msra.mxu0 %v1782_v51  ;;  %v757_v58 = vmul.f32 0.00390625, %v1589_v55 }
 0x1a1   : > { %v1591_v27 = vpop.f32.mrb[27].mxu0  ;;  %1784 = vmatprep.subr.bf16.mxu0 %v2059_v50 }
 0x1a2   : > { %v1592_v57 = vadd.f32 %v1591_v27, %v1590_v56 }
 0x1a3   : > { %1671 = vmatmul.mubr.msk.f32.vlgmr.msra.gmra.mrb[18].mxu1 %vm766_vm1, %v2350_v3  ;;  %v762_v3 = vld [vmem:[%s2660_s3 + $0x8] sm:$0xff] }
 0x1a4   : > { %v758_v59 = vmul.f32 0.00390625, %v1592_v57  ;;  %v1593_v60 = vpop.f32.mrb[28].mxu0  ;;  %1694 = vmatprep.mubr.msk.f32.mxu1 %vm1006_vm2, %v990_v10 }
 0x1a5   : > { %v1594_v61 = vpop.f32.mrb[29].mxu0 }
 0x1a6   : > { %v1785_v62 = vpack.c.bf16 %v758_v59, %v757_v58  ;;  %v1595_v63 = vadd.f32 %v1594_v61, %v1593_v60  ;;  %v1003_v58 = vld [vmem:[%s2663_s6 + $0x28] sm:$0xff]  ;;  %v1002_v60 = vld [vmem:[%s2663_s6 + $0x20] sm:$0xff] }
 0x1a8   : > { %v1596_v0 = vpop.f32.mrb[30].mxu0  ;;  %1786 = vmatpush3.bf16.msra.mxu0 %v1785_v62  ;;  %v759_v6 = vmul.f32 0.00390625, %v1595_v63 }
 0x1a9   : > { %v1597_v4 = vpop.f32.mrb[31].mxu0  ;;  %1787 = vmatprep.subr.bf16.mxu0 %v2059_v50 }
 0x1aa   : > { %v1598_v5 = vadd.f32 %v1597_v4, %v1596_v0 }
 0x1ac   : > { %v760_v7 = vmul.f32 0.00390625, %v1598_v5  ;;  %v1005_v5 = vld [vmem:[%s2663_s6 + $0x38] sm:$0xff] }
 0x1ae   : > { %v1788_v8 = vpack.c.bf16 %v760_v7, %v759_v6  ;;  %v1004_v7 = vld [vmem:[%s2663_s6 + $0x30] sm:$0xff] }
 0x1b0   : > { %1789 = vmatpush3.bf16.msra.mxu0 %v1788_v8 }
 0x1b3   : > { %1690 = vmatmul.mubr.msk.f32.vlgmr.msra.gmra.mrb[32].mxu0 %vm766_vm1, %v762_v3 }
 0x266   : > { %v835_v11 = vpop.f32.mrb[16].mxu1 }
 0x267   : > { %v1653_v50 = vpop.f32.mrb[17].mxu1 }
 0x276   : > { %v907_v12 = vpop.f32.mrb[18].mxu1 }
 0x277   : > { %v908_v13 = vadd.f32 %v907_v12, %v835_v11  ;;  %v1672_v14 = vpop.f32.mrb[19].mxu1 }
 0x286   : > { %v980_v15 = vpop.f32.mrb[32].mxu0 }
 0x287   : > { %v984_v17 = vadd.f32 %v980_v15, %v908_v13  ;;  %v1691_v18 = vpop.f32.mrb[33].mxu0 }
 0x289   : > { %v986_v19 = vadd.f32 %v985_v16, %v984_v17 }
 0x28b   : > { %vm987_vm3 = vcmp.gt.f32.partialorder %v986_v19, 0.0  ;;  %v988_v20 = vmul.f32 0.01, %v986_v19 }
 0x28d   : > { %v989_v21 = vsel %vm987_vm3, %v986_v19, %v988_v20 }
 0x28e   : > { %1692 = vmatprep.subr.mxu1 %v989_v21 }
 0x28f   : > { %1693 = vmatpush3.msra.mxu1 %v989_v21 }
 0x290   : > { %1695 = vmatmul.mubr.msk.f32.vlgmr.msra.gmra.mrb[20].mxu1 %vm1006_vm2, %v991_v22 }
 0x291   : > { %1697 = vmatprep.mubr.msk.f32.mxu1 %vm1006_vm2, %v992_v23 }
 0x294   : > { %1698 = vmatmul.mubr.msk.f32.gmra.mrb[22].mxu1 %vm1006_vm2, %v993_v24 }
 0x295   : > { %1700 = vmatprep.mubr.msk.f32.mxu1 %vm1006_vm2, %v994_v25 }
 0x298   : > { %1701 = vmatmul.mubr.msk.f32.gmra.mrb[24].mxu1 %vm1006_vm2, %v995_v26 }
 0x299   : > { %1703 = vmatprep.mubr.msk.f32.mxu1 %vm1006_vm2, %v996_v28 }
 0x29c   : > { %1704 = vmatmul.mubr.msk.f32.gmra.mrb[26].mxu1 %vm1006_vm2, %v997_v29 }
 0x363   : > { %v1696_v33 = vpop.f32.mrb[20].mxu1 }
 0x364   : > { %v1103_v52 = vadd.f32 %v1696_v33, %v999_v31  ;;  %v1097_v53 = vpop.f32.mrb[21].mxu1 }
 0x365   : > { %v1098_v54 = vadd.f32 %v1097_v53, %v998_v32 }
 0x366   : > { %v1415_v2 = vmul.f32 -1.442695, %v1103_v52 }
 0x367   : > { %v1414_v51 = vmul.f32 -1.442695, %v1098_v54  ;;  %v1699_v55 = vpop.f32.mrb[22].mxu1 }
 0x368   : > { %1858 = vpow2.f32 %v1415_v2  ;;  %v1113_v56 = vadd.f32 %v1699_v55, %v1001_v1  ;;  %v1107_v27 = vpop.f32.mrb[23].mxu1 }
 0x369   : > { %1860 = vpow2.f32 %v1414_v51  ;;  %v1108_v57 = vadd.f32 %v1107_v27, %v1000_v9 }
 0x36a   : > { %v1417_v59 = vmul.f32 -1.442695, %v1113_v56 }
 0x36b   : > { %v1416_v61 = vmul.f32 -1.442695, %v1108_v57  ;;  %v1702_v62 = vpop.f32.mrb[24].mxu1 }
 0x36c   : > { %1862 = vpow2.f32 %v1417_v59  ;;  %v1123_v63 = vadd.f32 %v1702_v62, %v1003_v58  ;;  %v1117_v0 = vpop.f32.mrb[25].mxu1 }
 0x36d   : > { %1864 = vpow2.f32 %v1416_v61  ;;  %v1118_v4 = vadd.f32 %v1117_v0, %v1002_v60 }
 0x36e   : > { %v1419_v6 = vmul.f32 -1.442695, %v1123_v63 }
 0x36f   : > { %v1418_v8 = vmul.f32 -1.442695, %v1118_v4  ;;  %v1705_v3 = vpop.f32.mrb[26].mxu1 }
 0x370   : > { %1866 = vpow2.f32 %v1419_v6  ;;  %v1133_v10 = vadd.f32 %v1705_v3, %v1005_v5  ;;  %v1127_v11 = vpop.f32.mrb[27].mxu1 }
 0x371   : > { %1868 = vpow2.f32 %v1418_v8  ;;  %v1128_v50 = vadd.f32 %v1127_v11, %v1004_v7 }
 0x372   : > { %v1859_v12 = vpop.eup %1858  ;;  %v1421_v13 = vmul.f32 -1.442695, %v1133_v10 }
 0x373   : > { %v1861_v14 = vpop.eup %1860  ;;  %v1161_v15 = vadd.f32 1.0, %v1859_v12  ;;  %v1420_v16 = vmul.f32 -1.442695, %v1128_v50 }
 0x374   : > { %v1160_v17 = vadd.f32 1.0, %v1861_v14  ;;  %1870 = vpow2.f32 %v1421_v13 }
 0x375   : > { %1872 = vrcp.f32 %v1161_v15 }
 0x376   : > { %v1863_v18 = vpop.eup %1862  ;;  %1874 = vrcp.f32 %v1160_v17 }
 0x377   : > { %v1865_v19 = vpop.eup %1864  ;;  %v1163_v20 = vadd.f32 1.0, %v1863_v18  ;;  %1876 = vpow2.f32 %v1420_v16 }
 0x378   : > { %v1162_v21 = vadd.f32 1.0, %v1865_v19 }
 0x379   : > { %1878 = vrcp.f32 %v1163_v20 }
 0x37a   : > { %v1867_v22 = vpop.eup %1866  ;;  %1880 = vrcp.f32 %v1162_v21 }
 0x37b   : > { %v1869_v23 = vpop.eup %1868  ;;  %v1165_v24 = vadd.f32 1.0, %v1867_v22 }
 0x37c   : > { %v1164_v25 = vadd.f32 1.0, %v1869_v23 }
 0x37e   : > { %v1871_v26 = vpop.eup %1870  ;;  %1882 = vrcp.f32 %v1164_v25 }
 0x37f   : > { %v1873_v28 = vpop.eup %1872  ;;  %1884 = vrcp.f32 %v1165_v24  ;;  %v1167_v29 = vadd.f32 1.0, %v1871_v26 }
 0x380   : > { %v1875_v30 = vpop.eup %1874  ;;  %1191 = vperm.xlu1 %1856, %v1873_v28  }
 0x381   : > { %v1877_v31 = vpop.eup %1876  ;;  %1186 = vperm.xlu0 %1857, %v1875_v30   ;;  %1886 = vrcp.f32 %v1167_v29 }
 0x382   : > { %v1166_v32 = vadd.f32 1.0, %v1877_v31 }
 0x383   : > { %v1879_v33 = vpop.eup %1878 }
 0x384   : > { %1888 = vrcp.f32 %v1166_v32  ;;  %1201 = vperm.xlu1 %1856, %v1879_v33   ;;  %v1881_v52 = vpop.eup %1880 }
 0x388   : > { %v1883_v53 = vpop.eup %1882  ;;  %1196 = vperm.xlu1 %1856, %v1881_v52  }
 0x389   : > { %v1885_v54 = vpop.eup %1884  ;;  %1206 = vperm.xlu0 %1857, %v1883_v53  }
 0x38b   : > { %v1887_v1 = vpop.eup %1886 }
 0x38c   : > { %1211 = vperm.xlu1 %1856, %v1885_v54  }
 0x38e   : > { %v1889_v2 = vpop.eup %1888 }
 0x38f   : > { %1216 = vperm.xlu0 %1857, %v1889_v2  }
 0x390   : > { %1221 = vperm.xlu1 %1856, %v1887_v1  }
 0x3ff   : > { %v1192_v9 = vpop.permute.xlu1 %1191 }
 0x400   : > { %v1226_v51 = vmul.f32 %v1192_v9, %v2421_v37  ;;  %v1227_v55 = vmul.f32 %v1192_v9, %v2416_v36  ;;  %v1187_v56 = vpop.permute.xlu0 %1186 }
 0x401   : > { %v1224_v27 = vmul.f32 %v1187_v56, %v2413_v35  ;;  %v1225_v57 = vmul.f32 %v1187_v56, %v2408_v34 }
 0x402   : > { %1242 = vst [vmem:[%s2576_s23 + $0x10] sm:$0xff] %v1226_v51  ;;  %1243 = vst [vmem:[%s2576_s23 + $0x18] sm:$0xff] %v1227_v55 }
 0x403   : > { %v1202_v37 = vpop.permute.xlu1 %1201  ;;  %1240 = vst [vmem:[%s2576_s23] sm:$0xff] %v1224_v27  ;;  %1241 = vst [vmem:[%s2576_s23 + $0x8] sm:$0xff] %v1225_v57 }
 0x404   : > { %v1230_v35 = vmul.f32 %v1202_v37, %v2437_v41  ;;  %v1231_v34 = vmul.f32 %v1202_v37, %v2432_v40 }
 0x406   : > { %1246 = vst [vmem:[%s2576_s23 + $0x30] sm:$0xff] %v1230_v35  ;;  %1247 = vst [vmem:[%s2576_s23 + $0x38] sm:$0xff] %v1231_v34 }
 0x407   : > { %v1197_v36 = vpop.permute.xlu1 %1196 }
 0x408   : > { %v1228_v58 = vmul.f32 %v1197_v36, %v2429_v39  ;;  %v1229_v59 = vmul.f32 %v1197_v36, %v2424_v38  ;;  %v1207_v60 = vpop.permute.xlu0 %1206 }
 0x409   : > { %v1232_v61 = vmul.f32 %v1207_v60, %v2445_v43  ;;  %v1233_v62 = vmul.f32 %v1207_v60, %v2440_v42 }
 0x40a   : > { %1244 = vst [vmem:[%s2576_s23 + $0x20] sm:$0xff] %v1228_v58  ;;  %1245 = vst [vmem:[%s2576_s23 + $0x28] sm:$0xff] %v1229_v59 }
 0x40b   : > { %1248 = vst [vmem:[%s2576_s23 + $0x40] sm:$0xff] %v1232_v61  ;;  %1249 = vst [vmem:[%s2576_s23 + $0x48] sm:$0xff] %v1233_v62  ;;  %v1212_v40 = vpop.permute.xlu1 %1211 }
 0x40c   : > { %v1234_v41 = vmul.f32 %v1212_v40, %v2453_v45  ;;  %v1235_v63 = vmul.f32 %v1212_v40, %v2448_v44 }
 0x40e   : > { %1250 = vst [vmem:[%s2576_s23 + $0x50] sm:$0xff] %v1234_v41  ;;  %1251 = vst [vmem:[%s2576_s23 + $0x58] sm:$0xff] %v1235_v63  ;;  %v1217_v38 = vpop.permute.xlu0 %1216 }
 0x40f   : > { %v1236_v39 = vmul.f32 %v1217_v38, %v2461_v47  ;;  %v1237_v42 = vmul.f32 %v1217_v38, %v2456_v46  ;;  %v1222_v43 = vpop.permute.xlu1 %1221 }
 0x410   : > { %v1238_v44 = vmul.f32 %v1222_v43, %v2469_v49  ;;  %v1239_v45 = vmul.f32 %v1222_v43, %v2464_v48 }
 0x411   : > { %1252 = vst [vmem:[%s2576_s23 + $0x60] sm:$0xff] %v1236_v39  ;;  %1253 = vst [vmem:[%s2576_s23 + $0x68] sm:$0xff] %v1237_v42 }
 0x412   : > { %1254 = vst [vmem:[%s2576_s23 + $0x70] sm:$0xff] %v1238_v44  ;;  %1255 = vst [vmem:[%s2576_s23 + $0x78] sm:$0xff] %v1239_v45 }
 0x413   : > { %1993 = shalt.err (!%p1990_p10)
}
 0x414   : > { %s1994_s20 = scalar_lea.hbm %s2605_s8, 2048  ;;  %s1998_s14 = scalar_lea.hbm %s2664_s7, 4096 }
 0x415   : > { %p1995_p11 = scmp.ne.s32.totalorder %s2605_s8, %s1994_s20  ;;  %p1999_p5 = scmp.lt.u32.totalorder %s2605_s8, %s2664_s7 }
 0x416   : > { %p2000_p2 = scmp.lt.u32.totalorder %s1998_s14, %s1994_s20  ;;  %p2002_p13 = scmp.lt.u32.totalorder %s1994_s20, %s2605_s8 }
 0x417   : > { %p1996_p4 = pnand %p1995_p11, %p2694_p7 }
 0x418   : > { %p2001_p1 = por %p2000_p2, %p1999_p5 }
 0x419   : > { %p1997_p3 = pneg %p1996_p4 }
 0x41a   : > { %p2003_p6 = por %p2002_p13, %p2001_p1 }
 0x41c   : > { %p2004_p9 = pnand %p2003_p6, %p1997_p3 }
 0x41e   : > { %2007 = shalt.err (!%p2004_p9)
}
 0x41f   : > { %s2064_s1 = smov 256   ;;  %s2065_s19 = smov 16  }
 0x420   : > { %1796 = dma.vmem_to_hbm [thread:$0]  (%p2694_p7), %s2607_s15, 2048, %s2605_s8, %s1257_s28, %s2064_s1, %s2064_s1, %s2065_s19  }
 0x421 PF: > { %s2695_s23 = sld [smem:[#allocation12_spill]]  ;;  %s1285_s10 = sand.u32 1, %s2038_s24  }
 0x422   : > { %p2696_p12 = scmp.ne.s32.totalorder %s2682_s13, 0  ;;  %s1286_s16 = scalar_lea.sflag [#allocation4], %s1285_s10 }
 0x427   : > { %p2697_p0 = scmp.ge.s32.totalorder %s2695_s23, 2 }
 0x429   : > { %p1809_p8 = pnand %p2697_p0, %p2696_p12 }
 0x42b   : > { %2033 = dma.done.wait (!%p1809_p8), %s1286_s16, 2048  }
 0x42c   : > { %2035 = vsyncadd (!%p1809_p8), %s1286_s16, 4294965248  ;;  %s2698_s27 = sld [smem:[#allocation13_spill]]  ;;  %s2699_s0 = sld [smem:[#allocation14_spill]] }
 0x42d   : > { %s2700_s24 = smov %s2042_s25  ;;  %s2701_s25 = smov %s2046_s26 }
 0x432   : > { %p23_p10 = scmp.ge.s32.totalorder %s2698_s27, 4   ;;  %s2702_s26 = smov %s2699_s0 }
 0x434   :  { %25 = sbr.rel (!%p23_p10) target bundleno = 10 (0xa), region = 117 }
 0x43b   :  { %1291 = vsyncpa [#allocation3], 1 }
 0x43c   :  { %1293 = vsyncpa [#allocation3 + $0x1], 1 }
 0x43d   :  { %1294 = vsyncpa [#allocation6], 1 }
 0x43e   :  { %1296 = vsyncpa [#allocation6 + $0x1], 1 }
 0x43f   :  { %1297 = vsyncpa [#allocation4], 1 }
 0x440   :  { %1299 = vsyncpa [#allocation4 + $0x1], 1 }

</bundles_post_ra>
